<compile_context>
chip_gen: v6e
topology: v6e:2x2x1
jax: 0.10.0
libtpu: 0.0.40
codegen_flags: <defaults>
</compile_context>

<pallas_src>
import jax
import jax.numpy as jnp
from jax.experimental import pallas as pl
from jax.experimental.pallas import tpu as pltpu

_LANE = 128
_SUBLANE = 8


def _cdiv(a, b):
    return -(-a // b)


def _round_up(x, m):
    return _cdiv(x, m) * m


def _even_num_tiles(total, cap):
    """Number of tiles covering `total` with tiles <= cap, rounded to an even
    count (>1) so v7x's two TensorCores split a 'parallel' grid evenly."""
    n = _cdiv(total, cap)
    if n > 1 and n % 2:
        n += 1
    return n


# ----------------------------------------------------------------------------
# Kernels
# ----------------------------------------------------------------------------
def _linear_kernel(x_ref, w_ref, b_ref, o_ref):
    # x_ref: (TM, K)  w_ref: (K, N)  b_ref: (1, N)  o_ref: (TM, N)
    acc = jnp.dot(x_ref[...], w_ref[...], preferred_element_type=jnp.float32)
    o_ref[...] = (acc + b_ref[...].astype(jnp.float32)).astype(o_ref.dtype)


def _linear_t_kernel(xT_ref, w_ref, b_ref, oT_ref):
    # Lane-dense layout: xT_ref: (K, TB)  w_ref: (N, K)  b_ref: (N, 1)
    # oT_ref: (N, TB).  Both the streamed input (last dim = TB) and the output
    # store (last dim = TB) are full, unmasked 128-lane accesses.
    acc = jnp.dot(w_ref[...], xT_ref[...], preferred_element_type=jnp.float32)
    oT_ref[...] = (acc + b_ref[...].astype(jnp.float32)).astype(oT_ref.dtype)


# ----------------------------------------------------------------------------
# Row-major wrapper (same calling convention as the PyTorch module)
# ----------------------------------------------------------------------------
def linear_pallas(
    x,
    w,
    b2d,
    *,
    grid_free_vmem_budget=20 << 20,   # padded-footprint gate for the grid-free path
    tile_cap_rows=8192,               # ~16 MiB double-buffered padded tiles
    vmem_limit_bytes=32 << 20,        # raise v5e's 16 MiB scoped default; == default on v6e/v7x
    cast_to_bf16=False,               # halve the x/W byte streams (f32 accumulation kept)
):
    """Computes x @ w + b2d  (w is the pre-transposed (in, out) weight)."""
    B, K = x.shape
    K2, N = w.shape
    assert K == K2 and b2d.shape == (1, N)
    out_dtype = x.dtype

    if cast_to_bf16:
        x = x.astype(jnp.bfloat16)
        w = w.astype(jnp.bfloat16)

    bytes_accessed = (
        x.size * x.dtype.itemsize
        + w.size * w.dtype.itemsize
        + b2d.size * b2d.dtype.itemsize
        + B * N * jnp.dtype(out_dtype).itemsize
    )
    cost = pl.CostEstimate(
        flops=2 * B * K * N, transcendentals=0, bytes_accessed=bytes_accessed
    )

    # Padded VMEM footprint estimate: last dim pads to 128 lanes, rows to 8.
    x_row_bytes = _round_up(K, _LANE) * x.dtype.itemsize
    o_row_bytes = _round_up(N, _LANE) * jnp.dtype(out_dtype).itemsize
    w_bytes = _round_up(K, _SUBLANE) * _round_up(N, _LANE) * w.dtype.itemsize
    grid_free_footprint = _round_up(B, _SUBLANE) * (x_row_bytes + o_row_bytes) + w_bytes

    if grid_free_footprint <= grid_free_vmem_budget:
        # Grid-free: whole problem resident in VMEM, no pipelining machinery.
        return pl.pallas_call(
            _linear_kernel,
            out_shape=jax.ShapeDtypeStruct((B, N), out_dtype),
            in_specs=[
                pl.BlockSpec(memory_space=pltpu.MemorySpace.VMEM),
                pl.BlockSpec(memory_space=pltpu.MemorySpace.VMEM),
                pl.BlockSpec(memory_space=pltpu.MemorySpace.VMEM),
            ],
            out_specs=pl.BlockSpec(memory_space=pltpu.MemorySpace.VMEM),
            compiler_params=pltpu.CompilerParams(vmem_limit_bytes=vmem_limit_bytes),
            cost_estimate=cost,
        )(x, w, b2d)

    # Tiled path: big row tiles; W/bias VMEM-resident via constant index_maps.
    n_tiles = _even_num_tiles(B, tile_cap_rows)
    tm = _round_up(_cdiv(B, n_tiles), _SUBLANE)
    grid = (_cdiv(B, tm),)
    return pl.pallas_call(
        _linear_kernel,
        out_shape=jax.ShapeDtypeStruct((B, N), out_dtype),
        grid_spec=pl.GridSpec(
            grid=grid,
            in_specs=[
                pl.BlockSpec((tm, K), lambda i: (i, 0)),   # x: walks batch tiles
                pl.BlockSpec((K, N), lambda i: (0, 0)),    # W: VMEM-resident
                pl.BlockSpec((1, N), lambda i: (0, 0)),    # b: VMEM-resident
            ],
            out_specs=pl.BlockSpec((tm, N), lambda i: (i, 0)),
        ),
        compiler_params=pltpu.CompilerParams(
            dimension_semantics=("parallel",),      # megacore / v7x 2-TC sharding
            vmem_limit_bytes=vmem_limit_bytes,
        ),
        cost_estimate=cost,
    )(x, w, b2d)


# ----------------------------------------------------------------------------
# Lane-dense (feature-major) wrapper: caller supplies x^T (K, B), W (N, K),
# bias as a column (N, 1); returns y^T (N, B).  Loads and stores are full
# 128-lane accesses and padded VMEM per sample drops ~3.5x.
# ----------------------------------------------------------------------------
def linear_pallas_feature_major(
    xT,
    w_nk,
    b_col,
    *,
    grid_free_vmem_budget=20 << 20,
    tile_cap_cols=16384,
    vmem_limit_bytes=32 << 20,
):
    K, B = xT.shape
    N, K2 = w_nk.shape
    assert K == K2 and b_col.shape == (N, 1)
    out_dtype = xT.dtype

    bytes_accessed = (
        xT.size * xT.dtype.itemsize
        + w_nk.size * w_nk.dtype.itemsize
        + b_col.size * b_col.dtype.itemsize
        + N * B * jnp.dtype(out_dtype).itemsize
    )
    cost = pl.CostEstimate(
        flops=2 * B * K * N, transcendentals=0, bytes_accessed=bytes_accessed
    )

    col_bytes = (
        _round_up(K, _SUBLANE) * xT.dtype.itemsize
        + _round_up(N, _SUBLANE) * jnp.dtype(out_dtype).itemsize
    )
    footprint = _round_up(B, _LANE) * col_bytes

    if footprint <= grid_free_vmem_budget:
        return pl.pallas_call(
            _linear_t_kernel,
            out_shape=jax.ShapeDtypeStruct((N, B), out_dtype),
            in_specs=[
                pl.BlockSpec(memory_space=pltpu.MemorySpace.VMEM),
                pl.BlockSpec(memory_space=pltpu.MemorySpace.VMEM),
                pl.BlockSpec(memory_space=pltpu.MemorySpace.VMEM),
            ],
            out_specs=pl.BlockSpec(memory_space=pltpu.MemorySpace.VMEM),
            compiler_params=pltpu.CompilerParams(vmem_limit_bytes=vmem_limit_bytes),
            cost_estimate=cost,
        )(xT, w_nk, b_col)

    n_tiles = _even_num_tiles(B, tile_cap_cols)
    tb = _round_up(_cdiv(B, n_tiles), _LANE)
    grid = (_cdiv(B, tb),)
    return pl.pallas_call(
        _linear_t_kernel,
        out_shape=jax.ShapeDtypeStruct((N, B), out_dtype),
        grid_spec=pl.GridSpec(
            grid=grid,
            in_specs=[
                pl.BlockSpec((K, tb), lambda i: (0, i)),   # x^T: walks column tiles
                pl.BlockSpec((N, K), lambda i: (0, 0)),    # W: VMEM-resident
                pl.BlockSpec((N, 1), lambda i: (0, 0)),    # b: VMEM-resident
            ],
            out_specs=pl.BlockSpec((N, tb), lambda i: (0, i)),
        ),
        compiler_params=pltpu.CompilerParams(
            dimension_semantics=("parallel",),
            vmem_limit_bytes=vmem_limit_bytes,
        ),
        cost_estimate=cost,
    )(xT, w_nk, b_col)


if __name__ == "__main__":
    key = jax.random.PRNGKey(0)
    kx, kw, kb, kx2 = jax.random.split(key, 4)

    IN, OUT = 50, 10

    # PyTorch nn.Linear(50, 10) has weight (10, 50), bias (10,). We store the
    # weight pre-transposed as (50, 10) so the row-major kernel is a plain matmul.
    w_t = jax.random.uniform(kw, (IN, OUT), jnp.float32, -0.1, 0.1)
    bias = jax.random.uniform(kb, (OUT,), jnp.float32, -0.1, 0.1)
    b2d = bias.reshape(1, OUT)          # hoisted once, outside the hot path

    # 1) Small batch (module-scale input): grid-free path.
    B_small = 8
    x_small = jax.random.normal(kx, (B_small, IN), jnp.float32)
    out_small = jax.block_until_ready(linear_pallas(x_small, w_t, b2d))
    ref_small = x_small @ w_t + bias
    assert out_small.shape == (B_small, OUT)
    assert jnp.allclose(out_small, ref_small, atol=1e-5, rtol=1e-5)

    # 2) Mid batch: with the raised padded-footprint gate this is still grid-free.
    B_mid = 4096
    x_mid = jax.random.normal(kx2, (B_mid, IN), jnp.float32)
    ref_mid = x_mid @ w_t + bias
    out_mid = jax.block_until_ready(linear_pallas(x_mid, w_t, b2d))
    assert jnp.allclose(out_mid, ref_mid, atol=1e-4, rtol=1e-4)

    # 3) Exercise the tiled "parallel" path (force it by lowering the gate).
    out_tiled = jax.block_until_ready(
        linear_pallas(x_mid, w_t, b2d, grid_free_vmem_budget=1 << 20, tile_cap_rows=1024)
    )
    assert jnp.allclose(out_tiled, ref_mid, atol=1e-4, rtol=1e-4)

    # 4) bf16 input path (f32 accumulation kept in-kernel).
    out_bf16 = jax.block_until_ready(linear_pallas(x_mid, w_t, b2d, cast_to_bf16=True))
    assert jnp.allclose(out_bf16, ref_mid, atol=3e-2, rtol=3e-2)

    # 5) Lane-dense feature-major path: y^T = W @ x^T (+ b), grid-free and tiled.
    xT = x_mid.T                         # (50, 4096)
    w_nk = w_t.T                         # (10, 50)  -- original PyTorch layout
    b_col = bias.reshape(OUT, 1)
    outT = jax.block_until_ready(linear_pallas_feature_major(xT, w_nk, b_col))
    assert jnp.allclose(outT.T, ref_mid, atol=1e-4, rtol=1e-4)
    outT2 = jax.block_until_ready(
        linear_pallas_feature_major(
            xT, w_nk, b_col, grid_free_vmem_budget=1 << 16, tile_cap_cols=1024
        )
    )
    assert jnp.allclose(outT2.T, ref_mid, atol=1e-4, rtol=1e-4)

    print("x.shape:", out_small.shape)   # mirrors the module's print of the output shape
    print("KERNEL_OK")
</pallas_src>

<mosaic_0001>
module attributes {stable_mosaic.version = 11 : i64} {
  func.func @_linear_kernel(%arg0: memref<8x50xf32, #tpu.memory_space<vmem>>, %arg1: memref<50x10xf32, #tpu.memory_space<vmem>>, %arg2: memref<1x10xf32, #tpu.memory_space<vmem>>, %arg3: memref<8x10xf32, #tpu.memory_space<vmem>>) attributes {dimension_semantics = [], scalar_prefetch = 0 : i64, scratch_operands = 0 : i64, tpu.core_type = #tpu.core_type<tc>} {
    %c0 = arith.constant 0 : index
    %c0_0 = arith.constant 0 : index
    %0 = vector.load %arg0[%c0, %c0_0] : memref<8x50xf32, #tpu.memory_space<vmem>>, vector<8x50xf32>
    %c0_1 = arith.constant 0 : index
    %c0_2 = arith.constant 0 : index
    %1 = vector.load %arg1[%c0_1, %c0_2] : memref<50x10xf32, #tpu.memory_space<vmem>>, vector<50x10xf32>
    %cst = arith.constant dense<0.000000e+00> : vector<8x10xf32>
    %2 = tpu.matmul %0, %1, %cst {dimension_numbers = #tpu.dot_dimension_numbers<[1], [0], [0], [1], [0, 0, 1, 1], [], []>} : vector<8x50xf32>, vector<50x10xf32>, vector<8x10xf32> -> vector<8x10xf32>
    %c0_3 = arith.constant 0 : index
    %c0_4 = arith.constant 0 : index
    %3 = vector.load %arg2[%c0_3, %c0_4] : memref<1x10xf32, #tpu.memory_space<vmem>>, vector<1x10xf32>
    %4 = vector.broadcast %3 : vector<1x10xf32> to vector<8x10xf32>
    %5 = arith.addf %2, %4 : vector<8x10xf32>
    %c0_5 = arith.constant 0 : index
    %c0_6 = arith.constant 0 : index
    %6 = vector.load %arg3[%c0_5, %c0_6] : memref<8x10xf32, #tpu.memory_space<vmem>>, vector<8x10xf32>
    tpu.vector_store %arg3[%c0_5, %c0_6], %5 {strides = array<i32>} : memref<8x10xf32, #tpu.memory_space<vmem>>, vector<8x10xf32>,
    return
  }
}

</mosaic_0001>

<bundles_post_ra>
// kernel: tpu_custom_call.1
= control target key start
LH: loop header
LB: loop body
LE: loop exit
PB: predicated region body
PF: predicated region fallthrough
CT: control target
= control target key end

     0   :  { %vm34_vm0 = vcmask 1041408   ;;  %v177_v1 = vmov 0.0   ;;  %vm178_vm1 = vmmov 0   ;;  %s230_s0 = inlined_call_operand.vmem [shape: f32[8,50], index: 0, kind: input, shape index: {}]   ;;  %s231_s1 = inlined_call_operand.vmem [shape: f32[50,10], index: 1, kind: input, shape index: {}]   ;;  %s232_s2 = inlined_call_operand.vmem [shape: f32[1,10], index: 2, kind: input, shape index: {}]   ;;  %s233_s3 = inlined_call_operand.hbm [shape: f32[8,10], index: 3, kind: output, shape index: {}]  }
   0x1   :  { %v22_v0 = vld [vmem:[%s231_s1 + $0x30] sm:$0x3]  ;;  %135 = vmatprep.subr.mxu0 %v177_v1  ;;  %v21_v2 = vld [vmem:[%s231_s1 + $0x28] sm:$0xff]  ;;  %149 = vmatprep.mubr.msk.f32.mxu0 %vm178_vm1, %v177_v1  ;;  %v20_v3 = vld [vmem:[%s231_s1 + $0x20] sm:$0xff] }
   0x2   :  { %136 = vmatpush3.msk.msra.mxu0 %vm34_vm0, %v22_v0 }
   0x3   :  { %137 = vmatprep.subr.mxu0 %v177_v1 }
   0x4   :  { %8 = vsyncpa [#allocation3], 0  ;;  %138 = vmatpush3.msra.mxu0 %v21_v2  ;;  %v19_v4 = vld [vmem:[%s231_s1 + $0x18] sm:$0xff]  ;;  %v18_v5 = vld [vmem:[%s231_s1 + $0x10] sm:$0xff]  ;;  %vm30_vm2 = vcmask 408576   ;;  %s179_s30 = smov [#allocation2]  }
   0x5   :  { %139 = vmatprep.subr.mxu0 %v177_v1  ;;  %v17_v6 = vld [vmem:[%s231_s1 + $0x8] sm:$0xff]  ;;  %v16_v7 = vld [vmem:[%s231_s1] sm:$0xff]  ;;  %s116_s4 = sshll.u32 %s179_s30, 4  ;;  %vm108_vm3 = vcmask 80896   ;;  %s117_s4 = int_to_ptr.vmem [resolvable:$true] %s116_s4 }
   0x6   :  { %140 = vmatpush3.msra.mxu0 %v20_v3  ;;  %v15_v8 = vld [vmem:[%s230_s0] sm:$0xff]  ;;  %s155_s1 = scalar_lea.vmem %s117_s4, 128  ;;  %p160_p1 = scmp.lt.s32.totalorder %s117_s4, %s117_s4 }
   0x7   :  { %141 = vmatprep.subr.mxu0 %v177_v1  ;;  %v124_v9 = vld [vmem:[%s232_s2] ss:$0 sm:$0xff]  ;;  %p156_p0 = scmp.ne.s32.totalorder %s117_s4, %s155_s1  ;;  %p161_p2 = scmp.lt.s32.totalorder %s155_s1, %s155_s1 }
   0x8   :  { %142 = vmatpush3.msra.mxu0 %v19_v4 }
   0x9   :  { %143 = vmatprep.subr.mxu0 %v177_v1  ;;  %p162_p3 = por %p161_p2, %p160_p1 }
   0xa   :  { %144 = vmatpush3.msra.mxu0 %v18_v5 }
   0xb   :  { %145 = vmatprep.subr.mxu0 %v177_v1  ;;  %p163_p4 = pnand %p162_p3, %p156_p0 }
   0xc   :  { %146 = vmatpush3.msra.mxu0 %v17_v6 }
   0xd   :  { %147 = vmatprep.subr.mxu0 %v177_v1 }
   0xe   :  { %148 = vmatpush3.msra.mxu0 %v16_v7 }
   0xf   :  { %150 = vmatmul.mubr.msk.f32.vlgmr.msra.gmra.mxu0 %vm30_vm2, %v15_v8 }
  0xcf   :  { %v104_v10 = vpop.f32.mrf.mxu0 }
  0xd0   :  { %v105_v11 = vadd.f32 %v124_v9, %v104_v10 }
  0xd1   :  { %v151_v12 = vpop.f32.mrf.mxu0 }
  0xd2   :  { %109 = vst.msk [vmem:[#allocation2] sm:$0xff] %vm108_vm3, %v105_v11 }
  0xd3   :  { %166 = shalt.err (!%p163_p4)
}
  0xd4   :  { %119 = dma.vmem_to_hbm [thread:$0]  %s117_s4, 128, %s233_s3, [#allocation3]  }
  0xd5   :  { %175 = dma.done.wait [#allocation3], 128  }
  0xd6   :  { %176 = vsyncadd [#allocation3], 4294967168 }
  0xd7   :  { %123 = vsyncpa [#allocation3], 1 }

</bundles_post_ra>
